<compile_context>
chip_gen: v7x
topology: tpu7x:2x2x1
jax: 0.10.0
libtpu: 0.0.40
codegen_flags: <defaults>
</compile_context>

<pallas_src>
import jax
import jax.numpy as jnp
from jax.experimental import pallas as pl
from jax.experimental.pallas import tpu as pltpu


LANE = 128


def _round_up(n, m):
    return ((n + m - 1) // m) * m


def _make_mlp4_kernel(num_class):
    """Kernel fusing 5 linear layers + ReLU + masked log_softmax for one batch tile."""

    def kernel(x_ref,
               w1_ref, b1_ref,
               w2_ref, b2_ref,
               w3_ref, b3_ref,
               w4_ref, b4_ref,
               w5_ref, b5_ref,
               o_ref):
        def dense(h, w_ref, b_ref):
            # bf16 x bf16 -> f32 accumulate on the MXU; f32 bias add on the VPU.
            return jnp.dot(h, w_ref[...], preferred_element_type=jnp.float32) + b_ref[...]

        def dense_relu(h, w_ref, b_ref):
            return jnp.maximum(dense(h, w_ref, b_ref), 0.0).astype(jnp.bfloat16)

        h = dense_relu(x_ref[...], w1_ref, b1_ref)
        h = dense_relu(h, w2_ref, b2_ref)
        h = dense_relu(h, w3_ref, b3_ref)
        h = dense_relu(h, w4_ref, b4_ref)
        logits = dense(h, w5_ref, b5_ref)              # (TB, padded_classes) f32

        # Mask the zero-padded class lanes so they do not perturb log_softmax.
        lane = jax.lax.broadcasted_iota(jnp.int32, logits.shape, 1)
        logits = jnp.where(lane < num_class, logits, jnp.float32(-1e30))

        # log_softmax over dim=1 (classes).
        m = jnp.max(logits, axis=-1, keepdims=True)
        shifted = logits - m
        lse = jnp.log(jnp.sum(jnp.exp(shifted), axis=-1, keepdims=True))
        o_ref[...] = (shifted - lse).astype(o_ref.dtype)

    return kernel


def mlp4_forward(x, params, *, batch_tile=512):
    """x: (B, 1, 28, 28) or (B, 784). params: list of (W, b), W=(in,out), b=(1,out)."""
    B = x.shape[0]
    in_dim = 28 * 28
    x2d = x.reshape(B, in_dim).astype(jnp.bfloat16)

    num_class = params[-1][0].shape[1]
    padded_c = _round_up(num_class, LANE)

    # Zero-pad every layer width to a 128-lane multiple; weights -> bf16,
    # biases stay f32 (added post-accumulation).
    flat_params = []
    pad_in = in_dim
    for (w, b) in params:
        fi, fo = w.shape
        pad_out = _round_up(fo, LANE)
        wp = jnp.zeros((pad_in, pad_out), jnp.bfloat16).at[:fi, :fo].set(
            w.astype(jnp.bfloat16))
        bp = jnp.zeros((1, pad_out), jnp.float32).at[:, :fo].set(
            b.astype(jnp.float32))
        flat_params += [wp, bp]
        pad_in = pad_out

    # Batch tile: large enough to fill the MXU M-dim / hide the x-stream DMA at
    # realistic batch sizes, shrunk (to a multiple of 8 sublanes) for tiny B.
    tb = batch_tile
    if B < tb:
        tb = max(8, _round_up(B, 8))
    grid = (pl.cdiv(B, tb),)

    x_spec = pl.BlockSpec((tb, in_dim), lambda i: (i, 0))
    # Constant index_map => weights/biases are VMEM-resident and fetched once.
    param_specs = [pl.BlockSpec(p.shape, lambda i: (0, 0)) for p in flat_params]
    out_spec = pl.BlockSpec((tb, padded_c), lambda i: (i, 0))

    out_padded = pl.pallas_call(
        _make_mlp4_kernel(num_class),
        out_shape=jax.ShapeDtypeStruct((B, padded_c), jnp.float32),
        grid=grid,
        in_specs=[x_spec] + param_specs,
        out_specs=out_spec,
        compiler_params=pltpu.CompilerParams(
            dimension_semantics=("parallel",),          # megacore-shard batch tiles
            vmem_limit_bytes=32 * 1024 * 1024,          # headroom for big tiles (v5e default is 16 MiB)
        ),
    )(x2d, *flat_params)

    return out_padded[:, :num_class]


def init_params(key, input_dim, hidden_dim, num_class):
    """nn.Linear-style init: U(-1/sqrt(fan_in), +1/sqrt(fan_in)); W=(in,out), b=(1,out)."""
    dims = [input_dim, hidden_dim, 200, 150, 100, num_class]
    params = []
    for i in range(5):
        fan_in, fan_out = dims[i], dims[i + 1]
        key, kw, kb = jax.random.split(key, 3)
        bound = 1.0 / jnp.sqrt(float(fan_in))
        w = jax.random.uniform(kw, (fan_in, fan_out), jnp.float32, -bound, bound)
        b = jax.random.uniform(kb, (1, fan_out), jnp.float32, -bound, bound)
        params.append((w, b))
    return params


def reference_forward(x, params, *, bf16):
    B = x.shape[0]
    if bf16:
        h = x.reshape(B, 28 * 28).astype(jnp.bfloat16)
        y = None
        for i, (w, b) in enumerate(params):
            y = jnp.dot(h, w.astype(jnp.bfloat16),
                        preferred_element_type=jnp.float32) + b.astype(jnp.float32)
            if i < 4:
                h = jnp.maximum(y, 0.0).astype(jnp.bfloat16)
        return jax.nn.log_softmax(y, axis=1)
    else:
        h = x.reshape(B, 28 * 28).astype(jnp.float32)
        for i, (w, b) in enumerate(params):
            h = jnp.dot(h, w) + b
            if i < 4:
                h = jnp.maximum(h, 0.0)
        return jax.nn.log_softmax(h, axis=1)


if __name__ == "__main__":
    key = jax.random.PRNGKey(0)
    k_x, k_p, k_x2 = jax.random.split(key, 3)

    B = 8
    input_dim = 28 * 28
    hidden_dim = 32
    num_class = 10

    x = jax.random.normal(k_x, (B, 1, 28, 28), dtype=jnp.float32)
    params = init_params(k_p, input_dim, hidden_dim, num_class)

    out = jax.block_until_ready(mlp4_forward(x, params))
    assert out.shape == (B, num_class)

    ref_bf16 = reference_forward(x, params, bf16=True)
    ref_f32 = reference_forward(x, params, bf16=False)
    assert jnp.allclose(out, ref_bf16, atol=1e-2, rtol=1e-2), "mismatch vs bf16 reference"
    assert jnp.allclose(out, ref_f32, atol=1e-1, rtol=1e-1), "mismatch vs f32 reference"

    # Exercise the multi-tile pipelined path, including a partial last tile.
    B2 = 40
    x2 = jax.random.normal(k_x2, (B2, 1, 28, 28), dtype=jnp.float32)
    out2 = jax.block_until_ready(mlp4_forward(x2, params, batch_tile=16))
    assert out2.shape == (B2, num_class)
    assert jnp.allclose(out2, reference_forward(x2, params, bf16=True),
                        atol=1e-2, rtol=1e-2), "mismatch on tiled batch"

    print("KERNEL_OK")
</pallas_src>

<mosaic_0001>
module attributes {stable_mosaic.version = 11 : i64} {
  func.func @kernel(%arg0: i32, %arg1: memref<8x784xbf16, #tpu.memory_space<vmem>>, %arg2: memref<784x128xbf16, #tpu.memory_space<vmem>>, %arg3: memref<1x128xf32, #tpu.memory_space<vmem>>, %arg4: memref<128x256xbf16, #tpu.memory_space<vmem>>, %arg5: memref<1x256xf32, #tpu.memory_space<vmem>>, %arg6: memref<256x256xbf16, #tpu.memory_space<vmem>>, %arg7: memref<1x256xf32, #tpu.memory_space<vmem>>, %arg8: memref<256x128xbf16, #tpu.memory_space<vmem>>, %arg9: memref<1x128xf32, #tpu.memory_space<vmem>>, %arg10: memref<128x128xbf16, #tpu.memory_space<vmem>>, %arg11: memref<1x128xf32, #tpu.memory_space<vmem>>, %arg12: memref<8x128xf32, #tpu.memory_space<vmem>>) attributes {dimension_semantics = [#tpu.dimension_semantics<parallel>], iteration_bounds = array<i64: 1>, scalar_prefetch = 0 : i64, scratch_operands = 0 : i64, tpu.core_type = #tpu.core_type<tc>, window_params = [{transform_indices = @transform_0, window_bounds = array<i64: 8, 784>}, {pipeline_mode = #tpu.pipeline_mode<synchronous>, transform_indices = @transform_1, window_bounds = array<i64: 784, 128>}, {pipeline_mode = #tpu.pipeline_mode<synchronous>, transform_indices = @transform_2, window_bounds = array<i64: 1, 128>}, {pipeline_mode = #tpu.pipeline_mode<synchronous>, transform_indices = @transform_3, window_bounds = array<i64: 128, 256>}, {pipeline_mode = #tpu.pipeline_mode<synchronous>, transform_indices = @transform_4, window_bounds = array<i64: 1, 256>}, {pipeline_mode = #tpu.pipeline_mode<synchronous>, transform_indices = @transform_5, window_bounds = array<i64: 256, 256>}, {pipeline_mode = #tpu.pipeline_mode<synchronous>, transform_indices = @transform_6, window_bounds = array<i64: 1, 256>}, {pipeline_mode = #tpu.pipeline_mode<synchronous>, transform_indices = @transform_7, window_bounds = array<i64: 256, 128>}, {pipeline_mode = #tpu.pipeline_mode<synchronous>, transform_indices = @transform_8, window_bounds = array<i64: 1, 128>}, {pipeline_mode = #tpu.pipeline_mode<synchronous>, transform_indices = @transform_9, window_bounds = array<i64: 128, 128>}, {pipeline_mode = #tpu.pipeline_mode<synchronous>, transform_indices = @transform_10, window_bounds = array<i64: 1, 128>}, {transform_indices = @transform_11, window_bounds = array<i64: 8, 128>}]} {
    %c0 = arith.constant 0 : index
    %c0_0 = arith.constant 0 : index
    %0 = vector.load %arg1[%c0, %c0_0] : memref<8x784xbf16, #tpu.memory_space<vmem>>, vector<8x784xbf16>
    %c0_1 = arith.constant 0 : index
    %c0_2 = arith.constant 0 : index
    %1 = vector.load %arg2[%c0_1, %c0_2] : memref<784x128xbf16, #tpu.memory_space<vmem>>, vector<784x128xbf16>
    %cst = arith.constant dense<0.000000e+00> : vector<8x128xf32>
    %2 = tpu.matmul %0, %1, %cst {dimension_numbers = #tpu.dot_dimension_numbers<[1], [0], [0], [1], [0, 0, 1, 1], [], []>} : vector<8x784xbf16>, vector<784x128xbf16>, vector<8x128xf32> -> vector<8x128xf32>
    %c0_3 = arith.constant 0 : index
    %c0_4 = arith.constant 0 : index
    %3 = vector.load %arg3[%c0_3, %c0_4] : memref<1x128xf32, #tpu.memory_space<vmem>>, vector<1x128xf32>
    %4 = vector.broadcast %3 : vector<1x128xf32> to vector<8x128xf32>
    %5 = arith.addf %2, %4 : vector<8x128xf32>
    %cst_5 = arith.constant 0.000000e+00 : f32
    %6 = vector.broadcast %cst_5 : f32 to vector<8x128xf32>
    %7 = arith.maximumf %5, %6 : vector<8x128xf32>
    %8 = arith.truncf %7 : vector<8x128xf32> to vector<8x128xbf16>
    %c0_6 = arith.constant 0 : index
    %c0_7 = arith.constant 0 : index
    %9 = vector.load %arg4[%c0_6, %c0_7] : memref<128x256xbf16, #tpu.memory_space<vmem>>, vector<128x256xbf16>
    %cst_8 = arith.constant dense<0.000000e+00> : vector<8x256xf32>
    %10 = tpu.matmul %8, %9, %cst_8 {dimension_numbers = #tpu.dot_dimension_numbers<[1], [0], [0], [1], [0, 0, 1, 1], [], []>} : vector<8x128xbf16>, vector<128x256xbf16>, vector<8x256xf32> -> vector<8x256xf32>
    %c0_9 = arith.constant 0 : index
    %c0_10 = arith.constant 0 : index
    %11 = vector.load %arg5[%c0_9, %c0_10] : memref<1x256xf32, #tpu.memory_space<vmem>>, vector<1x256xf32>
    %12 = vector.broadcast %11 : vector<1x256xf32> to vector<8x256xf32>
    %13 = arith.addf %10, %12 : vector<8x256xf32>
    %cst_11 = arith.constant 0.000000e+00 : f32
    %14 = vector.broadcast %cst_11 : f32 to vector<8x256xf32>
    %15 = arith.maximumf %13, %14 : vector<8x256xf32>
    %16 = arith.truncf %15 : vector<8x256xf32> to vector<8x256xbf16>
    %c0_12 = arith.constant 0 : index
    %c0_13 = arith.constant 0 : index
    %17 = vector.load %arg6[%c0_12, %c0_13] : memref<256x256xbf16, #tpu.memory_space<vmem>>, vector<256x256xbf16>
    %cst_14 = arith.constant dense<0.000000e+00> : vector<8x256xf32>
    %18 = tpu.matmul %16, %17, %cst_14 {dimension_numbers = #tpu.dot_dimension_numbers<[1], [0], [0], [1], [0, 0, 1, 1], [], []>} : vector<8x256xbf16>, vector<256x256xbf16>, vector<8x256xf32> -> vector<8x256xf32>
    %c0_15 = arith.constant 0 : index
    %c0_16 = arith.constant 0 : index
    %19 = vector.load %arg7[%c0_15, %c0_16] : memref<1x256xf32, #tpu.memory_space<vmem>>, vector<1x256xf32>
    %20 = vector.broadcast %19 : vector<1x256xf32> to vector<8x256xf32>
    %21 = arith.addf %18, %20 : vector<8x256xf32>
    %cst_17 = arith.constant 0.000000e+00 : f32
    %22 = vector.broadcast %cst_17 : f32 to vector<8x256xf32>
    %23 = arith.maximumf %21, %22 : vector<8x256xf32>
    %24 = arith.truncf %23 : vector<8x256xf32> to vector<8x256xbf16>
    %c0_18 = arith.constant 0 : index
    %c0_19 = arith.constant 0 : index
    %25 = vector.load %arg8[%c0_18, %c0_19] : memref<256x128xbf16, #tpu.memory_space<vmem>>, vector<256x128xbf16>
    %cst_20 = arith.constant dense<0.000000e+00> : vector<8x128xf32>
    %26 = tpu.matmul %24, %25, %cst_20 {dimension_numbers = #tpu.dot_dimension_numbers<[1], [0], [0], [1], [0, 0, 1, 1], [], []>} : vector<8x256xbf16>, vector<256x128xbf16>, vector<8x128xf32> -> vector<8x128xf32>
    %c0_21 = arith.constant 0 : index
    %c0_22 = arith.constant 0 : index
    %27 = vector.load %arg9[%c0_21, %c0_22] : memref<1x128xf32, #tpu.memory_space<vmem>>, vector<1x128xf32>
    %28 = vector.broadcast %27 : vector<1x128xf32> to vector<8x128xf32>
    %29 = arith.addf %26, %28 : vector<8x128xf32>
    %cst_23 = arith.constant 0.000000e+00 : f32
    %30 = vector.broadcast %cst_23 : f32 to vector<8x128xf32>
    %31 = arith.maximumf %29, %30 : vector<8x128xf32>
    %32 = arith.truncf %31 : vector<8x128xf32> to vector<8x128xbf16>
    %c0_24 = arith.constant 0 : index
    %c0_25 = arith.constant 0 : index
    %33 = vector.load %arg10[%c0_24, %c0_25] : memref<128x128xbf16, #tpu.memory_space<vmem>>, vector<128x128xbf16>
    %cst_26 = arith.constant dense<0.000000e+00> : vector<8x128xf32>
    %34 = tpu.matmul %32, %33, %cst_26 {dimension_numbers = #tpu.dot_dimension_numbers<[1], [0], [0], [1], [0, 0, 1, 1], [], []>} : vector<8x128xbf16>, vector<128x128xbf16>, vector<8x128xf32> -> vector<8x128xf32>
    %c0_27 = arith.constant 0 : index
    %c0_28 = arith.constant 0 : index
    %35 = vector.load %arg11[%c0_27, %c0_28] : memref<1x128xf32, #tpu.memory_space<vmem>>, vector<1x128xf32>
    %36 = vector.broadcast %35 : vector<1x128xf32> to vector<8x128xf32>
    %37 = arith.addf %34, %36 : vector<8x128xf32>
    %38 = tpu.iota {dimensions = array<i32: 1>} : vector<8x128xi32>
    %c10_i32 = arith.constant 10 : i32
    %39 = vector.broadcast %c10_i32 : i32 to vector<8x128xi32>
    %40 = arith.cmpi slt, %38, %39 : vector<8x128xi32>
    %cst_29 = arith.constant -1.000000e+30 : f32
    %41 = vector.broadcast %cst_29 : f32 to vector<8x128xf32>
    %42 = arith.select %40, %37, %41 : vector<8x128xi1>, vector<8x128xf32>
    %cst_30 = arith.constant dense<0xFF800000> : vector<8xf32>
    %43 = vector.multi_reduction <maximumf>, %42, %cst_30 [1] : vector<8x128xf32> to vector<8xf32>
    %44 = vector.shape_cast %43 : vector<8xf32> to vector<8x1xf32>
    %45 = vector.broadcast %44 : vector<8x1xf32> to vector<8x128xf32>
    %46 = arith.subf %42, %45 : vector<8x128xf32>
    %47 = math.exp %46 : vector<8x128xf32>
    %cst_31 = arith.constant dense<0.000000e+00> : vector<8xf32>
    %48 = vector.multi_reduction <add>, %47, %cst_31 [1] : vector<8x128xf32> to vector<8xf32>
    %49 = vector.shape_cast %48 : vector<8xf32> to vector<8x1xf32>
    %50 = math.log %49 : vector<8x1xf32>
    %51 = vector.broadcast %50 : vector<8x1xf32> to vector<8x128xf32>
    %52 = arith.subf %46, %51 : vector<8x128xf32>
    %c0_32 = arith.constant 0 : index
    %c0_33 = arith.constant 0 : index
    %53 = vector.load %arg12[%c0_32, %c0_33] : memref<8x128xf32, #tpu.memory_space<vmem>>, vector<8x128xf32>
    tpu.vector_store %arg12[%c0_32, %c0_33], %52 {strides = array<i32>} : memref<8x128xf32, #tpu.memory_space<vmem>>, vector<8x128xf32>,
    return
  }
  func.func @transform_0(%arg0: i32) -> (i32, i32) {
    %c0_i32 = arith.constant 0 : i32
    %c0_i32_0 = arith.constant 0 : i32
    return %arg0, %c0_i32 : i32, i32
  }
  func.func @transform_1(%arg0: i32) -> (i32, i32) {
    %c0_i32 = arith.constant 0 : i32
    %c0_i32_0 = arith.constant 0 : i32
    %c0_i32_1 = arith.constant 0 : i32
    return %c0_i32, %c0_i32_0 : i32, i32
  }
  func.func @transform_2(%arg0: i32) -> (i32, i32) {
    %c0_i32 = arith.constant 0 : i32
    %c0_i32_0 = arith.constant 0 : i32
    %c0_i32_1 = arith.constant 0 : i32
    return %c0_i32, %c0_i32_0 : i32, i32
  }
  func.func @transform_3(%arg0: i32) -> (i32, i32) {
    %c0_i32 = arith.constant 0 : i32
    %c0_i32_0 = arith.constant 0 : i32
    %c0_i32_1 = arith.constant 0 : i32
    return %c0_i32, %c0_i32_0 : i32, i32
  }
  func.func @transform_4(%arg0: i32) -> (i32, i32) {
    %c0_i32 = arith.constant 0 : i32
    %c0_i32_0 = arith.constant 0 : i32
    %c0_i32_1 = arith.constant 0 : i32
    return %c0_i32, %c0_i32_0 : i32, i32
  }
  func.func @transform_5(%arg0: i32) -> (i32, i32) {
    %c0_i32 = arith.constant 0 : i32
    %c0_i32_0 = arith.constant 0 : i32
    %c0_i32_1 = arith.constant 0 : i32
    return %c0_i32, %c0_i32_0 : i32, i32
  }
  func.func @transform_6(%arg0: i32) -> (i32, i32) {
    %c0_i32 = arith.constant 0 : i32
    %c0_i32_0 = arith.constant 0 : i32
    %c0_i32_1 = arith.constant 0 : i32
    return %c0_i32, %c0_i32_0 : i32, i32
  }
  func.func @transform_7(%arg0: i32) -> (i32, i32) {
    %c0_i32 = arith.constant 0 : i32
    %c0_i32_0 = arith.constant 0 : i32
    %c0_i32_1 = arith.constant 0 : i32
    return %c0_i32, %c0_i32_0 : i32, i32
  }
  func.func @transform_8(%arg0: i32) -> (i32, i32) {
    %c0_i32 = arith.constant 0 : i32
    %c0_i32_0 = arith.constant 0 : i32
    %c0_i32_1 = arith.constant 0 : i32
    return %c0_i32, %c0_i32_0 : i32, i32
  }
  func.func @transform_9(%arg0: i32) -> (i32, i32) {
    %c0_i32 = arith.constant 0 : i32
    %c0_i32_0 = arith.constant 0 : i32
    %c0_i32_1 = arith.constant 0 : i32
    return %c0_i32, %c0_i32_0 : i32, i32
  }
  func.func @transform_10(%arg0: i32) -> (i32, i32) {
    %c0_i32 = arith.constant 0 : i32
    %c0_i32_0 = arith.constant 0 : i32
    %c0_i32_1 = arith.constant 0 : i32
    return %c0_i32, %c0_i32_0 : i32, i32
  }
  func.func @transform_11(%arg0: i32) -> (i32, i32) {
    %c0_i32 = arith.constant 0 : i32
    %c0_i32_0 = arith.constant 0 : i32
    return %arg0, %c0_i32 : i32, i32
  }
}

</mosaic_0001>

<bundles_post_ra>
// kernel: tpu_custom_call.1
= control target key start
LH: loop header
LB: loop body
LE: loop exit
PB: predicated region body
PF: predicated region fallthrough
CT: control target
= control target key end

     0   :  { %16 = vsyncpa [#allocation3], 0  ;;  %s2230_s0 = inlined_call_operand.hbm [shape: bf16[8,784], index: 0, kind: input, shape index: {}]   ;;  %s2231_s1 = inlined_call_operand.hbm [shape: bf16[784,128], index: 1, kind: input, shape index: {}]   ;;  %s2232_s2 = inlined_call_operand.vmem [shape: f32[1,128], index: 2, kind: input, shape index: {}]   ;;  %s2233_s3 = inlined_call_operand.hbm [shape: bf16[128,256], index: 3, kind: input, shape index: {}]   ;;  %s2234_s4 = inlined_call_operand.vmem [shape: f32[1,256], index: 4, kind: input, shape index: {}]   ;;  %s2235_s5 = inlined_call_operand.hbm [shape: bf16[256,256], index: 5, kind: input, shape index: {}]   ;;  %s2236_s6 = inlined_call_operand.vmem [shape: f32[1,256], index: 6, kind: input, shape index: {}]   ;;  %s2237_s7 = inlined_call_operand.hbm [shape: bf16[256,128], index: 7, kind: input, shape index: {}]   ;;  %s2238_s8 = inlined_call_operand.vmem [shape: f32[1,128], index: 8, kind: input, shape index: {}]   ;;  %s2239_s9 = inlined_call_operand.hbm [shape: bf16[128,128], index: 9, kind: input, shape index: {}]   ;;  %s2240_s10 = inlined_call_operand.vmem [shape: f32[1,128], index: 10, kind: input, shape index: {}]   ;;  %s2241_s11 = inlined_call_operand.hbm [shape: f32[8,128], index: 11, kind: output, shape index: {}]  }
   0x1   :  { %17 = vsyncpa [#allocation6], 0 }
   0x2   :  { %18 = vsyncpa [#allocation9], 0 }
   0x3   :  { %19 = vsyncpa [#allocation12], 0 }
   0x4   :  { %20 = vsyncpa [#allocation4], 0  ;;  %s2027_s17 = smov [#allocation5]   ;;  %s1863_s21 = scalar_lea.hbm %s2231_s1, 6272 }
   0x5   :  { %s36_s18 = sshll.u32 %s2027_s17, 4  ;;  %p1864_p0 = scmp.ne.s32.totalorder %s2231_s1, %s1863_s21  ;;  %s37_s18 = int_to_ptr.vmem [resolvable:$true] %s36_s18 }
   0x6   :  { %p1867_p1 = scmp.lt.u32.totalorder %s1863_s21, %s2231_s1 }
   0x8   :  { %p1869_p2 = pnand %p1867_p1, %p1864_p0 }
   0xa   :  { %1872 = shalt.err (!%p1869_p2)
}
   0xb   :  { %s1873_s26 = scalar_lea.vmem %s37_s18, 6272  ;;  %p1878_p4 = scmp.lt.s32.totalorder %s37_s18, %s37_s18 }
   0xc   :  { %p1874_p3 = scmp.ne.s32.totalorder %s37_s18, %s1873_s26  ;;  %p1879_p5 = scmp.lt.s32.totalorder %s1873_s26, %s1873_s26 }
   0xe   :  { %p1880_p6 = por %p1879_p5, %p1878_p4 }
  0x10   :  { %p1881_p7 = pnand %p1880_p6, %p1874_p3 }
  0x12   :  { %1884 = shalt.err (!%p1881_p7)
}
  0x13   :  { %s2028_s27 = smov 64   ;;  %s2029_s28 = smov 4  }
  0x14   :  { %42 = dma.hbm_to_vmem [thread:$0]  %s2231_s1, 6272, %s37_s18, [#allocation6], %s2028_s27, %s2028_s27, %s2029_s28  }
  0x15   :  { %s2030_s12 = smov [#allocation8]   ;;  %s2031_s14 = smov [#allocation2]  }
  0x16   :  { %s64_s13 = sshll.u32 %s2030_s12, 4  ;;  %s27_s15 = sshll.u32 %s2031_s14, 4  ;;  %s65_s13 = int_to_ptr.vmem [resolvable:$true] %s64_s13  ;;  %s28_s15 = int_to_ptr.vmem [resolvable:$true] %s27_s15 }
  0x17   :  { %s1885_s19 = scalar_lea.hbm %s2235_s5, 4096 }
  0x18   :  { %p1886_p8 = scmp.ne.s32.totalorder %s2235_s5, %s1885_s19  ;;  %p1889_p9 = scmp.lt.u32.totalorder %s1885_s19, %s2235_s5 }
  0x1a   :  { %p1891_p10 = pnand %p1889_p9, %p1886_p8 }
  0x1c   :  { %1894 = shalt.err (!%p1891_p10)
}
  0x1d   :  { %s1895_s1 = scalar_lea.vmem %s65_s13, 4096  ;;  %p1900_p12 = scmp.lt.s32.totalorder %s65_s13, %s65_s13 }
  0x1e   :  { %p1896_p11 = scmp.ne.s32.totalorder %s65_s13, %s1895_s1  ;;  %p1901_p13 = scmp.lt.s32.totalorder %s1895_s1, %s1895_s1 }
  0x20   :  { %p1902_p0 = por %p1901_p13, %p1900_p12 }
  0x22   :  { %p1903_p1 = pnand %p1902_p0, %p1896_p11 }
  0x24   :  { %1906 = shalt.err (!%p1903_p1)
}
  0x25   :  { %s2032_s18 = smov 128   ;;  %s2033_s24 = smov 8  }
  0x26   :  { %70 = dma.hbm_to_vmem [thread:$0]  %s2235_s5, 4096, %s65_s13, [#allocation9], %s2032_s18, %s2032_s18, %s2033_s24  }
  0x27   :  { %s1907_s12 = scalar_lea.hbm %s2230_s0, 448 }
  0x28   :  { %p1908_p2 = scmp.ne.s32.totalorder %s2230_s0, %s1907_s12  ;;  %p1911_p3 = scmp.lt.u32.totalorder %s1907_s12, %s2230_s0 }
  0x2a   :  { %p1913_p4 = pnand %p1911_p3, %p1908_p2 }
  0x2c   :  { %1916 = shalt.err (!%p1913_p4)
}
  0x2d   :  { %s1917_s20 = scalar_lea.vmem %s28_s15, 448  ;;  %p1922_p6 = scmp.lt.s32.totalorder %s28_s15, %s28_s15 }
  0x2e   :  { %p1918_p5 = scmp.ne.s32.totalorder %s28_s15, %s1917_s20  ;;  %p1923_p7 = scmp.lt.s32.totalorder %s1917_s20, %s1917_s20 }
  0x30   :  { %p1924_p8 = por %p1923_p7, %p1922_p6 }
  0x32   :  { %p1925_p9 = pnand %p1924_p8, %p1918_p5 }
  0x34   :  { %1928 = shalt.err (!%p1925_p9)
}
  0x35   :  { %30 = dma.hbm_to_vmem [thread:$0]  %s2230_s0, 448, %s28_s15, [#allocation3]  }
  0x36   :  { %s2034_s21 = smov [#allocation7]   ;;  %s2035_s23 = smov [#allocation10]  }
  0x37   :  { %s50_s22 = sshll.u32 %s2034_s21, 4  ;;  %s78_s1 = sshll.u32 %s2035_s23, 4  ;;  %s51_s22 = int_to_ptr.vmem [resolvable:$true] %s50_s22  ;;  %s79_s1 = int_to_ptr.vmem [resolvable:$true] %s78_s1 }
  0x38   :  { %s1929_s29 = scalar_lea.hbm %s2233_s3, 2048 }
  0x39   :  { %p1930_p10 = scmp.ne.s32.totalorder %s2233_s3, %s1929_s29  ;;  %p1933_p11 = scmp.lt.u32.totalorder %s1929_s29, %s2233_s3 }
  0x3b   :  { %p1935_p12 = pnand %p1933_p11, %p1930_p10 }
  0x3d   :  { %1938 = shalt.err (!%p1935_p12)
}
  0x3e   :  { %s1939_s0 = scalar_lea.vmem %s51_s22, 2048  ;;  %p1944_p0 = scmp.lt.s32.totalorder %s51_s22, %s51_s22 }
  0x3f   :  { %p1940_p13 = scmp.ne.s32.totalorder %s51_s22, %s1939_s0  ;;  %p1945_p1 = scmp.lt.s32.totalorder %s1939_s0, %s1939_s0 }
  0x41   :  { %p1946_p2 = por %p1945_p1, %p1944_p0 }
  0x43   :  { %p1947_p3 = pnand %p1946_p2, %p1940_p13 }
  0x45   :  { %1950 = shalt.err (!%p1947_p3)
}
  0x46   :  { %56 = dma.hbm_to_vmem [thread:$0]  %s2233_s3, 2048, %s51_s22, [#allocation6], %s2032_s18, %s2032_s18, %s2033_s24  }
  0x47   :  { %s1951_s5 = scalar_lea.hbm %s2237_s7, 2048 }
  0x48   :  { %p1952_p4 = scmp.ne.s32.totalorder %s2237_s7, %s1951_s5  ;;  %p1955_p5 = scmp.lt.u32.totalorder %s1951_s5, %s2237_s7 }
  0x4a   :  { %p1957_p6 = pnand %p1955_p5, %p1952_p4 }
  0x4c   :  { %1960 = shalt.err (!%p1957_p6)
}
  0x4d   :  { %s1961_s26 = scalar_lea.vmem %s79_s1, 2048  ;;  %p1966_p8 = scmp.lt.s32.totalorder %s79_s1, %s79_s1 }
  0x4e   :  { %p1962_p7 = scmp.ne.s32.totalorder %s79_s1, %s1961_s26  ;;  %p1967_p9 = scmp.lt.s32.totalorder %s1961_s26, %s1961_s26 }
  0x50   :  { %p1968_p10 = por %p1967_p9, %p1966_p8 }
  0x52   :  { %p1969_p11 = pnand %p1968_p10, %p1962_p7 }
  0x54   :  { %1972 = shalt.err (!%p1969_p11)
}
  0x55   :  { %84 = dma.hbm_to_vmem [thread:$0]  %s2237_s7, 2048, %s79_s1, [#allocation9], %s2028_s27, %s2028_s27, %s2029_s28  }
  0x56   :  { %s2036_s24 = smov [#allocation11]   ;;  %s1973_s12 = scalar_lea.hbm %s2239_s9, 1024 }
  0x57   :  { %s92_s22 = sshll.u32 %s2036_s24, 4  ;;  %p1974_p12 = scmp.ne.s32.totalorder %s2239_s9, %s1973_s12  ;;  %s93_s22 = int_to_ptr.vmem [resolvable:$true] %s92_s22 }
  0x58   :  { %p1977_p13 = scmp.lt.u32.totalorder %s1973_s12, %s2239_s9 }
  0x5a   :  { %p1979_p0 = pnand %p1977_p13, %p1974_p12 }
  0x5c   :  { %1982 = shalt.err (!%p1979_p0)
}
  0x5d   :  { %s1983_s17 = scalar_lea.vmem %s93_s22, 1024  ;;  %p1988_p2 = scmp.lt.s32.totalorder %s93_s22, %s93_s22 }
  0x5e   :  { %p1984_p1 = scmp.ne.s32.totalorder %s93_s22, %s1983_s17  ;;  %p1989_p3 = scmp.lt.s32.totalorder %s1983_s17, %s1983_s17 }
  0x60   :  { %p1990_p4 = por %p1989_p3, %p1988_p2 }
  0x62   :  { %p1991_p5 = pnand %p1990_p4, %p1984_p1 }
  0x64   :  { %1994 = shalt.err (!%p1991_p5)
}
  0x65   :  { %98 = dma.hbm_to_vmem [thread:$0]  %s2239_s9, 1024, %s93_s22, [#allocation12], %s2028_s27, %s2028_s27, %s2029_s28  }
  0x66   :  { %2017 = dma.done.wait [#allocation3], 448  }
  0x67   :  { %2018 = vsyncadd [#allocation3], 4294966848 }
  0x68   :  { %2019 = dma.done.wait [#allocation6], 8320  }
  0x69   :  { %2020 = vsyncadd [#allocation6], 4294958976 }
  0x6a   :  { %2021 = dma.done.wait [#allocation9], 6144  }
  0x6b   :  { %2022 = vsyncadd [#allocation9], 4294961152 }
  0x6c   :  { %2023 = dma.done.wait [#allocation12], 1024  }
  0x6d   :  { %2024 = vsyncadd [#allocation12], 4294966272  ;;  %v1707_v0 = vld [vmem:[#allocation5 + $0x40] sm:$0xff]   ;;  %v1711_v4 = vld [vmem:[#allocation5 + $0x48] sm:$0xff]   ;;  %v2037_v43 = vmov 0.0   ;;  %vm2038_vm0 = vmmov 0  }
  0x6e   :  { %v1708_v1 = vld [vmem:[#allocation5] sm:$0xff]   ;;  %1568 = vmatprep.subr.bf16.mxu0 %v1707_v0  ;;  %v1712_v5 = vld [vmem:[#allocation5 + $0x8] sm:$0xff]   ;;  %v1715_v8 = vld [vmem:[#allocation5 + $0x50] sm:$0xff]   ;;  %vm547_vm1 = vcmask 130048  }
  0x6f   :  { %v1709_v2 = vld [vmem:[#allocation5 + $0xc0] sm:$0xff]   ;;  %1569 = vmatpush3.bf16.msra.mxu0 %v1708_v1  ;;  %v1713_v6 = vld [vmem:[#allocation5 + $0xc8] sm:$0xff]   ;;  %v1716_v9 = vld [vmem:[#allocation5 + $0x10] sm:$0xff]  }
  0x70   :  { %v1710_v3 = vld [vmem:[#allocation5 + $0x80] sm:$0xff]   ;;  %1590 = vmatprep.subr.bf16.mxu1 %v1709_v2  ;;  %1570 = vmatprep.subr.bf16.mxu0 %v1711_v4  ;;  %v1714_v7 = vld [vmem:[#allocation5 + $0x88] sm:$0xff]   ;;  %v1717_v10 = vld [vmem:[#allocation5 + $0xd0] sm:$0xff]  }
  0x71   :  { %1591 = vmatpush3.bf16.msra.mxu1 %v1710_v3  ;;  %v1718_v11 = vld [vmem:[#allocation5 + $0x90] sm:$0xff]   ;;  %v1719_v12 = vld [vmem:[#allocation5 + $0x58] sm:$0xff]   ;;  %v1723_v16 = vld [vmem:[#allocation5 + $0x60] sm:$0xff]  }
  0x72   :  { %1592 = vmatprep.subr.bf16.mxu1 %v1713_v6  ;;  %v1720_v13 = vld [vmem:[#allocation5 + $0x18] sm:$0xff]   ;;  %v1724_v17 = vld [vmem:[#allocation5 + $0x20] sm:$0xff]   ;;  %v1727_v20 = vld [vmem:[#allocation5 + $0x68] sm:$0xff]  }
  0x73   :  { %1571 = vmatpush3.bf16.msra.mxu0 %v1712_v5  ;;  %v1721_v14 = vld [vmem:[#allocation5 + $0xd8] sm:$0xff]   ;;  %v1725_v18 = vld [vmem:[#allocation5 + $0xe0] sm:$0xff]   ;;  %v1728_v21 = vld [vmem:[#allocation5 + $0x28] sm:$0xff]  }
  0x74   :  { %1572 = vmatprep.subr.bf16.mxu0 %v1715_v8  ;;  %v1722_v15 = vld [vmem:[#allocation5 + $0x98] sm:$0xff]   ;;  %v1726_v19 = vld [vmem:[#allocation5 + $0xa0] sm:$0xff]   ;;  %v1729_v22 = vld [vmem:[#allocation5 + $0xe8] sm:$0xff]  }
  0x75   :  { %1593 = vmatpush3.bf16.msra.mxu1 %v1714_v7  ;;  %v1730_v23 = vld [vmem:[#allocation5 + $0xa8] sm:$0xff]   ;;  %v1731_v24 = vld [vmem:[#allocation5 + $0x70] sm:$0xff]   ;;  %v1735_v28 = vld [vmem:[#allocation5 + $0x78] sm:$0xff]  }
  0x76   :  { %1594 = vmatprep.subr.bf16.mxu1 %v1717_v10  ;;  %v1732_v25 = vld [vmem:[#allocation5 + $0x30] sm:$0xff]   ;;  %v1736_v29 = vld [vmem:[#allocation5 + $0x38] sm:$0xff]   ;;  %v120_v31 = vld [vmem:[#allocation2] sm:$0xff] }
  0x77   :  { %1573 = vmatpush3.bf16.msra.mxu0 %v1716_v9  ;;  %v1733_v26 = vld [vmem:[#allocation5 + $0xf0] sm:$0xff]   ;;  %v1737_v30 = vld [vmem:[#allocation5 + $0xf8] sm:$0xff]   ;;  %v1437_v32 = vcombine.low %v120_v31, %v120_v31  ;;  %v1438_v33 = vcombine.high %v120_v31, %v120_v31  ;;  %v1741_v35 = vld [vmem:[#allocation5 + $0x140] sm:$0xff]  }
  0x78   :  { %1574 = vmatprep.subr.bf16.mxu0 %v1719_v12  ;;  %v1734_v27 = vld [vmem:[#allocation5 + $0xb0] sm:$0xff]   ;;  %v1740_v34 = vld [vmem:[#allocation5 + $0xb8] sm:$0xff]   ;;  %v1744_v39 = vld [vmem:[#allocation5 + $0x100] sm:$0xff]   ;;  %v2039_v12 = vmov 0  }
  0x79   :  { %1595 = vmatpush3.bf16.msra.mxu1 %v1718_v11  ;;  %v121_v36 = vld [vmem:[#allocation2 + $0x8] sm:$0xff]  ;;  %583 = vmatprep.mubr.bf16.mxu0 %v1438_v33  ;;  %v1749_v45 = vld [vmem:[#allocation5 + $0x158] sm:$0xff]   ;;  %v1751_v47 = vld [vmem:[#allocation5 + $0x160] sm:$0xff]  }
  0x7a   :  { %1596 = vmatprep.subr.bf16.mxu1 %v1721_v14  ;;  %v1439_v37 = vcombine.low %v121_v36, %v121_v36  ;;  %v1440_v38 = vcombine.high %v121_v36, %v121_v36  ;;  %v1745_v40 = vld [vmem:[#allocation5 + $0x148] sm:$0xff]   ;;  %v1747_v42 = vld [vmem:[#allocation5 + $0x150] sm:$0xff]   ;;  %v1750_v46 = vld [vmem:[#allocation5 + $0x118] sm:$0xff]  }
  0x7b   :  { %1575 = vmatpush3.bf16.msra.mxu0 %v1720_v13  ;;  %v1746_v41 = vld [vmem:[#allocation5 + $0x108] sm:$0xff]   ;;  %v1748_v44 = vld [vmem:[#allocation5 + $0x110] sm:$0xff]   ;;  %v1752_v48 = vld [vmem:[#allocation5 + $0x120] sm:$0xff]  }
  0x7c   :  { %1576 = vmatprep.subr.bf16.mxu0 %v1723_v16  ;;  %623 = vmatprep.mubr.bf16.mxu1 %v1440_v38  ;;  %v1753_v49 = vld [vmem:[#allocation5 + $0x168] sm:$0xff]   ;;  %v1759_v50 = vld [vmem:[#allocation5 + $0x180] sm:$0xff]   ;;  %v122_v51 = vld [vmem:[#allocation2 + $0x10] sm:$0xff] }
  0x7d   :  { %1597 = vmatpush3.bf16.msra.mxu1 %v1722_v15  ;;  %v1754_v52 = vld [vmem:[#allocation5 + $0x128] sm:$0xff]   ;;  %v1442_v53 = vcombine.high %v122_v51, %v122_v51  ;;  %v1762_v54 = vld [vmem:[#allocation2 + $0x18] ss:$0 sps:$4 sm:$0xff]   ;;  %v1755_v55 = vld [vmem:[#allocation5 + $0x170] sm:$0xff]   ;;  %v1441_v59 = vcombine.low %v122_v51, %v122_v51 }
  0x7e   :  { %1598 = vmatprep.subr.bf16.mxu1 %v1725_v18  ;;  %v1756_v56 = vld [vmem:[#allocation5 + $0x130] sm:$0xff]   ;;  %v1757_v57 = vld [vmem:[#allocation5 + $0x178] sm:$0xff]  }
  0x7f   :  { %1577 = vmatpush3.bf16.msra.mxu0 %v1724_v17  ;;  %v1758_v58 = vld [vmem:[#allocation5 + $0x138] sm:$0xff]   ;;  %v1763_v60 = vld [vmem:[#allocation7] ss:$8 sps:$4 sm:$0xff]   ;;  %v1765_v61 = vld [vmem:[#allocation7 + $0x4] ss:$8 sps:$4 sm:$0xff]  }
  0x80   :  { %1578 = vmatprep.subr.bf16.mxu0 %v1727_v20  ;;  %v1768_v62 = vld [vmem:[#allocation7 + $0x14] ss:$8 sps:$4 sm:$0xff]   ;;  %v1766_v63 = vld [vmem:[#allocation7 + $0x10] ss:$8 sps:$4 sm:$0xff]   ;;  %v1771_v0 = vld [vmem:[#allocation7 + $0x24] ss:$8 sps:$4 sm:$0xff]  }
  0x81   :  { %1599 = vmatpush3.bf16.msra.mxu1 %v1726_v19  ;;  %v1769_v1 = vld [vmem:[#allocation7 + $0x20] ss:$8 sps:$4 sm:$0xff]   ;;  %v1774_v2 = vld [vmem:[#allocation7 + $0x34] ss:$8 sps:$4 sm:$0xff]   ;;  %v1772_v3 = vld [vmem:[#allocation7 + $0x30] ss:$8 sps:$4 sm:$0xff]  }
  0x82   :  { %1600 = vmatprep.subr.bf16.mxu1 %v1729_v22  ;;  %v1777_v4 = vld [vmem:[#allocation7 + $0x44] ss:$8 sps:$4 sm:$0xff]   ;;  %v1775_v5 = vld [vmem:[#allocation7 + $0x40] ss:$8 sps:$4 sm:$0xff]   ;;  %v1780_v6 = vld [vmem:[#allocation7 + $0x54] ss:$8 sps:$4 sm:$0xff]  }
  0x83   :  { %1579 = vmatpush3.bf16.msra.mxu0 %v1728_v21  ;;  %v1778_v7 = vld [vmem:[#allocation7 + $0x50] ss:$8 sps:$4 sm:$0xff]   ;;  %v1783_v8 = vld [vmem:[#allocation7 + $0x64] ss:$8 sps:$4 sm:$0xff]   ;;  %v1781_v9 = vld [vmem:[#allocation7 + $0x60] ss:$8 sps:$4 sm:$0xff]  }
  0x84   :  { %1580 = vmatprep.subr.bf16.mxu0 %v1731_v24  ;;  %v1786_v10 = vld [vmem:[#allocation7 + $0x74] ss:$8 sps:$4 sm:$0xff]   ;;  %v1784_v11 = vld [vmem:[#allocation7 + $0x70] ss:$8 sps:$4 sm:$0xff]   ;;  %v1787_v13 = vld [vmem:[#allocation8] ss:$8 sps:$4 sm:$0xff]  }
  0x85   :  { %1601 = vmatpush3.bf16.msra.mxu1 %v1730_v23  ;;  %v1789_v14 = vld [vmem:[#allocation8 + $0x4] ss:$8 sps:$4 sm:$0xff]   ;;  %v1792_v15 = vld [vmem:[#allocation8 + $0x14] ss:$8 sps:$4 sm:$0xff]   ;;  %v1790_v16 = vld [vmem:[#allocation8 + $0x10] ss:$8 sps:$4 sm:$0xff]  }
  0x86   :  { %1602 = vmatprep.subr.bf16.mxu1 %v1733_v26  ;;  %v1795_v17 = vld [vmem:[#allocation8 + $0x24] ss:$8 sps:$4 sm:$0xff]   ;;  %v1793_v18 = vld [vmem:[#allocation8 + $0x20] ss:$8 sps:$4 sm:$0xff]   ;;  %v1798_v19 = vld [vmem:[#allocation8 + $0x34] ss:$8 sps:$4 sm:$0xff]  }
  0x87   :  { %1581 = vmatpush3.bf16.msra.mxu0 %v1732_v25  ;;  %v1796_v20 = vld [vmem:[#allocation8 + $0x30] ss:$8 sps:$4 sm:$0xff]   ;;  %v1801_v21 = vld [vmem:[#allocation8 + $0x44] ss:$8 sps:$4 sm:$0xff]   ;;  %v1799_v22 = vld [vmem:[#allocation8 + $0x40] ss:$8 sps:$4 sm:$0xff]  }
  0x88   :  { %1582 = vmatprep.subr.bf16.mxu0 %v1735_v28  ;;  %v1804_v23 = vld [vmem:[#allocation8 + $0x54] ss:$8 sps:$4 sm:$0xff]   ;;  %v1802_v24 = vld [vmem:[#allocation8 + $0x50] ss:$8 sps:$4 sm:$0xff]   ;;  %v1807_v25 = vld [vmem:[#allocation8 + $0x64] ss:$8 sps:$4 sm:$0xff]  }
  0x89   :  { %1603 = vmatpush3.bf16.msra.mxu1 %v1734_v27  ;;  %v1805_v26 = vld [vmem:[#allocation8 + $0x60] ss:$8 sps:$4 sm:$0xff]   ;;  %v1810_v27 = vld [vmem:[#allocation8 + $0x74] ss:$8 sps:$4 sm:$0xff]   ;;  %v1808_v28 = vld [vmem:[#allocation8 + $0x70] ss:$8 sps:$4 sm:$0xff]  }
  0x8a   :  { %1604 = vmatprep.subr.bf16.mxu1 %v1737_v30  ;;  %v1811_v30 = vld [vmem:[#allocation8 + $0x80] ss:$8 sps:$4 sm:$0xff]   ;;  %v1816_v31 = vld [vmem:[#allocation8 + $0x94] ss:$8 sps:$4 sm:$0xff]   ;;  %v1819_v33 = vld [vmem:[#allocation8 + $0xa4] ss:$8 sps:$4 sm:$0xff]  }
  0x8b   :  { %1583 = vmatpush3.bf16.msra.mxu0 %v1736_v29  ;;  %v1813_v29 = vld [vmem:[#allocation8 + $0x84] ss:$8 sps:$4 sm:$0xff]   ;;  %v1820_v36 = vld [vmem:[#allocation8 + $0xb0] ss:$8 sps:$4 sm:$0xff]   ;;  %v1823_v38 = vld [vmem:[#allocation8 + $0xc0] ss:$8 sps:$4 sm:$0xff]  }
  0x8c   :  { %1612 = vmatprep.subr.bf16.mxu0 %v1741_v35  ;;  %v1822_v35 = vld [vmem:[#allocation8 + $0xb4] ss:$8 sps:$4 sm:$0xff]  }
  0x8d   :  { %1605 = vmatpush3.bf16.msra.mxu1 %v1740_v34  ;;  %v1817_v34 = vld [vmem:[#allocation8 + $0xa0] ss:$8 sps:$4 sm:$0xff]  }
  0x8e   :  { %584 = vmatmul.mubr.bf16.vlgmr.msra.gmra.mrb[0].mxu0 %v1437_v32  ;;  %1667 = vmatprep.subr.bf16.mxu1 %v2037_v43  ;;  %v1814_v32 = vld [vmem:[#allocation8 + $0x90] ss:$8 sps:$4 sm:$0xff]  }
  0x8f   :  { %1613 = vmatpush3.bf16.msra.mxu0 %v1744_v39  ;;  %663 = vmatprep.mubr.bf16.mxu0 %v1442_v53  ;;  %v1828_v39 = vld [vmem:[#allocation8 + $0xd4] ss:$8 sps:$4 sm:$0xff]  }
  0x90   :  { %624 = vmatmul.mubr.bf16.vlgmr.msra.gmra.mrb[0].mxu1 %v1439_v37  ;;  %1614 = vmatprep.subr.bf16.mxu0 %v1745_v40  ;;  %v1825_v37 = vld [vmem:[#allocation8 + $0xc4] ss:$8 sps:$4 sm:$0xff]   ;;  %v1826_v40 = vld [vmem:[#allocation8 + $0xd0] ss:$8 sps:$4 sm:$0xff]  }
  0x91   :  { %1669 = vmatprep.mubr.msk.bf16.mxu1 %vm2038_vm0, %v2037_v43  ;;  %1668 = vmatpush3.bf16.msra.mxu1 %v1759_v50 }
  0x92   :  { %821 = vmatprep.subr.bf16.mxu1 %v1765_v61 }
  0x93   :  { %1615 = vmatpush3.bf16.msra.mxu0 %v1746_v41 }
  0x94   :  { %1616 = vmatprep.subr.bf16.mxu0 %v1747_v42  ;;  %v1436_v42 = vld [vmem:[%s2232_s2] ss:$0 sm:$0xff] }
  0x97   :  { %1617 = vmatpush3.bf16.msra.mxu0 %v1748_v44 }
  0x98   :  { %1618 = vmatprep.subr.bf16.mxu0 %v1749_v45  ;;  %1670 = vmatmul.mubr.msk.bf16.vlgmr.msra.gmra.mrb[4].mxu1 %vm547_vm1, %v1762_v54 }
  0x99   :  { %822 = vmatpush1.bf16.msra.mxu1 %v1763_v60  ;;  %853 = vmatprep.mubr.bf16.mxu1 %v2039_v12  ;;  %v1839_v12 = vld [vmem:[#allocation10 + $0x50] sm:$0xff]  }
  0x9a   :  { %823 = vmatprep.subr.bf16.mxu1 %v1768_v62 }
  0x9b   :  { %1619 = vmatpush3.bf16.msra.mxu0 %v1750_v46 }
  0x9c   :  { %1620 = vmatprep.subr.bf16.mxu0 %v1751_v47 }
  0x9d   :  { %824 = vmatpush1.bf16.msra.mxu1 %v1766_v63 }
  0x9e   :  { %825 = vmatprep.subr.bf16.mxu1 %v1771_v0 }
  0x9f   :  { %1621 = vmatpush3.bf16.msra.mxu0 %v1752_v48 }
  0xa0   :  { %1622 = vmatprep.subr.bf16.mxu0 %v1753_v49 }
  0xa1   :  { %826 = vmatpush1.bf16.msra.mxu1 %v1769_v1 }
  0xa2   :  { %827 = vmatprep.subr.bf16.mxu1 %v1774_v2 }
  0xa3   :  { %1623 = vmatpush3.bf16.msra.mxu0 %v1754_v52 }
  0xa4   :  { %1624 = vmatprep.subr.bf16.mxu0 %v1755_v55 }
  0xa5   :  { %828 = vmatpush1.bf16.msra.mxu1 %v1772_v3 }
  0xa6   :  { %829 = vmatprep.subr.bf16.mxu1 %v1777_v4  ;;  %v1831_v4 = vld [vmem:[#allocation8 + $0xe4] ss:$8 sps:$4 sm:$0xff]  }
  0xa7   :  { %1625 = vmatpush3.bf16.msra.mxu0 %v1756_v56 }
  0xa8   :  { %1626 = vmatprep.subr.bf16.mxu0 %v1757_v57 }
  0xa9   :  { %830 = vmatpush1.bf16.msra.mxu1 %v1775_v5  ;;  %v1829_v5 = vld [vmem:[#allocation8 + $0xe0] ss:$8 sps:$4 sm:$0xff]  }
  0xaa   :  { %831 = vmatprep.subr.bf16.mxu1 %v1780_v6  ;;  %v1834_v6 = vld [vmem:[#allocation8 + $0xf4] ss:$8 sps:$4 sm:$0xff]  }
  0xab   :  { %1627 = vmatpush3.bf16.msra.mxu0 %v1758_v58 }
  0xac   :  { %1070 = vmatprep.subr.bf16.mxu0 %v1789_v14  ;;  %v1841_v14 = vld [vmem:[#allocation10 + $0x58] sm:$0xff]  }
  0xad   :  { %832 = vmatpush1.bf16.msra.mxu1 %v1778_v7  ;;  %v1832_v7 = vld [vmem:[#allocation8 + $0xf0] ss:$8 sps:$4 sm:$0xff]  }
  0xae   :  { %664 = vmatmul.mubr.bf16.vlgmr.msra.gmra.mrb[4].mxu0 %v1441_v59  ;;  %833 = vmatprep.subr.bf16.mxu1 %v1783_v8  ;;  %v1835_v8 = vld [vmem:[#allocation10 + $0x40] sm:$0xff]  }
  0xaf   :  { %1071 = vmatpush1.bf16.msra.mxu0 %v1787_v13  ;;  %v1840_v13 = vld [vmem:[#allocation10 + $0x10] sm:$0xff]  }
  0xb0   :  { %1072 = vmatprep.subr.bf16.mxu0 %v1792_v15  ;;  %v1842_v15 = vld [vmem:[#allocation10 + $0x18] sm:$0xff]  }
  0xb1   :  { %834 = vmatpush1.bf16.msra.mxu1 %v1781_v9  ;;  %v1836_v9 = vld [vmem:[#allocation10] sm:$0xff]  }
  0xb2   :  { %835 = vmatprep.subr.bf16.mxu1 %v1786_v10  ;;  %v1837_v10 = vld [vmem:[#allocation10 + $0x48] sm:$0xff]  }
  0xb3   :  { %1073 = vmatpush1.bf16.msra.mxu0 %v1790_v16  ;;  %v1843_v16 = vld [vmem:[#allocation10 + $0x60] sm:$0xff]  }
  0xb4   :  { %1074 = vmatprep.subr.bf16.mxu0 %v1795_v17  ;;  %v1844_v17 = vld [vmem:[#allocation10 + $0x20] sm:$0xff]  }
  0xb5   :  { %836 = vmatpush1.bf16.msra.mxu1 %v1784_v11  ;;  %v1838_v11 = vld [vmem:[#allocation10 + $0x8] sm:$0xff]  }
  0xb6   :  { %1636 = vmatprep.subr.bf16.mxu1 %v1835_v8 }
  0xb7   :  { %1075 = vmatpush1.bf16.msra.mxu0 %v1793_v18  ;;  %v1845_v18 = vld [vmem:[#allocation10 + $0x68] sm:$0xff]  }
  0xb8   :  { %1076 = vmatprep.subr.bf16.mxu0 %v1798_v19  ;;  %v1846_v19 = vld [vmem:[#allocation10 + $0x28] sm:$0xff]  }
  0xbb   :  { %1077 = vmatpush1.bf16.msra.mxu0 %v1796_v20  ;;  %v731_v20 = vlaneseq }
  0xbc   :  { %1078 = vmatprep.subr.bf16.mxu0 %v1801_v21 }
  0xbd   :  { %v732_v21 = vshrl.u32 %v731_v20, 7  ;;  %v1404_v8 = vand.u32 127, %v731_v20 }
  0xbf   :  { %1079 = vmatpush1.bf16.msra.mxu0 %v1799_v22  ;;  %v733_v22 = vsub.s32 0, %v732_v21  ;;  %vm1405_vm2 = vcmp.lt.s32.totalorder %v1404_v8, 10 }
  0xc0   :  { %1080 = vmatprep.subr.bf16.mxu0 %v1804_v23  ;;  %v729_v23 = vld [vmem:[%s2234_s4] sm:$0x3] }
  0xc3   :  { %1081 = vmatpush1.bf16.msra.mxu0 %v1802_v24  ;;  %v737_v24 = vsub.s32 1, %v732_v21 }
  0xc4   :  { %1082 = vmatprep.subr.bf16.mxu0 %v1807_v25  ;;  %v734_v25 = vrot.slane %v729_v23, %v733_v22 }
  0xc7   :  { %1083 = vmatpush1.bf16.msra.mxu0 %v1805_v26  ;;  %v738_v26 = vrot.slane %v729_v23, %v737_v24 }
  0xc8   :  { %1084 = vmatprep.subr.bf16.mxu0 %v1810_v27 }
  0xcb   :  { %1085 = vmatpush1.bf16.msra.mxu0 %v1808_v28 }
  0xcc   :  { %1086 = vmatprep.subr.bf16.mxu0 %v1813_v29 }
  0xcf   :  { %1087 = vmatpush1.bf16.msra.mxu0 %v1811_v30 }
  0xd0   :  { %1088 = vmatprep.subr.bf16.mxu0 %v1816_v31 }
  0xd3   :  { %1089 = vmatpush1.bf16.msra.mxu0 %v1814_v32 }
  0xd4   :  { %1090 = vmatprep.subr.bf16.mxu0 %v1819_v33 }
  0xd7   :  { %1091 = vmatpush1.bf16.msra.mxu0 %v1817_v34 }
  0xd8   :  { %1092 = vmatprep.subr.bf16.mxu0 %v1822_v35 }
  0xdb   :  { %1093 = vmatpush1.bf16.msra.mxu0 %v1820_v36 }
  0xdc   :  { %1094 = vmatprep.subr.bf16.mxu0 %v1825_v37  ;;  %v1847_v37 = vld [vmem:[#allocation10 + $0x70] sm:$0xff]  }
  0xdf   :  { %1095 = vmatpush1.bf16.msra.mxu0 %v1823_v38  ;;  %v1848_v38 = vld [vmem:[#allocation10 + $0x30] sm:$0xff]  }
  0xe0   :  { %1096 = vmatprep.subr.bf16.mxu0 %v1828_v39  ;;  %v1849_v39 = vld [vmem:[#allocation10 + $0x78] sm:$0xff]  }
  0xe3   :  { %1097 = vmatpush1.bf16.msra.mxu0 %v1826_v40  ;;  %v1850_v40 = vld [vmem:[#allocation10 + $0x38] sm:$0xff]  }
  0xe4   :  { %1098 = vmatprep.subr.bf16.mxu0 %v1831_v4 }
  0xe7   :  { %1099 = vmatpush1.bf16.msra.mxu0 %v1829_v5 }
  0xe8   :  { %1100 = vmatprep.subr.bf16.mxu0 %v1834_v6 }
  0xeb   :  { %1101 = vmatpush1.bf16.msra.mxu0 %v1832_v7 }
 0x161   :  { %v1584_v41 = vpop.f32.mrb[0].mxu0 }
 0x162   :  { %v1585_v44 = vpop.f32.mrb[1].mxu0 }
 0x163   :  { %v1586_v45 = vadd.f32 %v1585_v44, %v1584_v41  ;;  %v1587_v46 = vpop.f32.mrb[2].mxu0  ;;  %v1606_v47 = vpop.f32.mrb[0].mxu1  ;;  %v898_v41 = vld [vmem:[%s2236_s6] sm:$0x3] }
 0x164   :  { %v1588_v48 = vpop.f32.mrb[3].mxu0  ;;  %v1607_v49 = vpop.f32.mrb[1].mxu1  ;;  %v907_v44 = vrot.slane %v898_v41, %v737_v24 }
 0x165   :  { %v586_v50 = vadd.f32 %v1586_v45, %v1436_v42  ;;  %v1608_v51 = vadd.f32 %v1607_v49, %v1606_v47  ;;  %v1609_v52 = vpop.f32.mrb[2].mxu1  ;;  %v903_v42 = vrot.slane %v898_v41, %v733_v22 }
 0x166   :  { %v1610_v53 = vpop.f32.mrb[3].mxu1 }
 0x167   :  { %v626_v54 = vadd.f32 %v1608_v51, %v586_v50 }
 0x16b   :  { %v705_v55 = vpop.f32.mrb[4].mxu1 }
 0x16c   :  { %v1671_v56 = vpop.f32.mrb[5].mxu1 }
 0x16d   :  { %v708_v57 = vpop.f32.mrb[6].mxu1  ;;  %v1852_v56 = vld [vmem:[#allocation11 + $0x8] sm:$0xff]  }
 0x16e   :  { %v1672_v58 = vpop.f32.mrb[7].mxu1  ;;  %v1853_v57 = vld [vmem:[#allocation11 + $0x10] sm:$0xff]  }
 0x16f   :  { %v1854_v58 = vld [vmem:[#allocation11 + $0x18] sm:$0xff]  }
 0x181   :  { %v1628_v59 = vpop.f32.mrb[4].mxu0 }
 0x182   :  { %v1629_v60 = vpop.f32.mrb[5].mxu0 }
 0x183   :  { %v1630_v61 = vadd.f32 %v1629_v60, %v1628_v59  ;;  %v1631_v62 = vpop.f32.mrb[6].mxu0  ;;  %v1855_v59 = vld [vmem:[#allocation11 + $0x20] sm:$0xff]   ;;  %v1856_v60 = vld [vmem:[#allocation11 + $0x28] sm:$0xff]  }
 0x184   :  { %v1632_v63 = vpop.f32.mrb[7].mxu0  ;;  %v1858_v62 = vld [vmem:[#allocation11 + $0x38] sm:$0xff]  }
 0x185   :  { %v666_v0 = vadd.f32 %v1630_v61, %v626_v54  ;;  %v1851_v54 = vld [vmem:[#allocation11] sm:$0xff]   ;;  %v1857_v61 = vld [vmem:[#allocation11 + $0x30] sm:$0xff]  }
 0x187   :  { %v706_v1 = vadd.f32 %v705_v55, %v666_v0  ;;  %v1542_v0 = vld [vmem:[%s2238_s8] ss:$0 sm:$0xff]  ;;  %s2040_s8 = smov [#allocation13]  }
 0x188   :  { %s1424_s21 = sshll.u32 %s2040_s8, 4  ;;  %s1425_s21 = int_to_ptr.vmem [resolvable:$true] %s1424_s21 }
 0x189   :  { %v711_v2 = vmax.f32 %v706_v1, 0.0  ;;  %p2000_p7 = scmp.lt.s32.totalorder %s1425_s21, %s1425_s21 }
 0x18b   :  { %v712_v3 = vpack.c.bf16 %v711_v2, %v711_v2 }
 0x18d   :  { %854 = vmatmul.mubr.bf16.vlgmr.msra.gmra.mrb[8].mxu1 %v712_v3 }
 0x18e   :  { %1637 = vmatpush3.bf16.msra.mxu1 %v1836_v9 }
 0x18f   :  { %1638 = vmatprep.subr.bf16.mxu1 %v1837_v10 }
 0x192   :  { %1639 = vmatpush3.bf16.msra.mxu1 %v1838_v11 }
 0x193   :  { %1640 = vmatprep.subr.bf16.mxu1 %v1839_v12 }
 0x196   :  { %1641 = vmatpush3.bf16.msra.mxu1 %v1840_v13 }
 0x197   :  { %1642 = vmatprep.subr.bf16.mxu1 %v1841_v14 }
 0x19a   :  { %1643 = vmatpush3.bf16.msra.mxu1 %v1842_v15 }
 0x19b   :  { %1644 = vmatprep.subr.bf16.mxu1 %v1843_v16 }
 0x19e   :  { %1645 = vmatpush3.bf16.msra.mxu1 %v1844_v17 }
 0x19f   :  { %1646 = vmatprep.subr.bf16.mxu1 %v1845_v18 }
 0x1a2   :  { %1647 = vmatpush3.bf16.msra.mxu1 %v1846_v19 }
 0x1a3   :  { %1648 = vmatprep.subr.bf16.mxu1 %v1847_v37 }
 0x1a6   :  { %1649 = vmatpush3.bf16.msra.mxu1 %v1848_v38 }
 0x1a7   :  { %1650 = vmatprep.subr.bf16.mxu1 %v1849_v39 }
 0x1aa   :  { %1651 = vmatpush3.bf16.msra.mxu1 %v1850_v40 }
 0x1ab   :  { %1673 = vmatprep.subr.bf16.mxu1 %v2037_v43 }
 0x260   :  { %v855_v27 = vpop.f32.mrb[8].mxu1 }
 0x261   :  { %v856_v28 = vadd.f32 %v855_v27, %v734_v25  ;;  %v857_v29 = vpop.f32.mrb[9].mxu1 }
 0x262   :  { %v858_v30 = vadd.f32 %v857_v29, %v738_v26  ;;  %v859_v31 = vpop.f32.mrb[10].mxu1 }
 0x263   :  { %v862_v32 = vmax.f32 %v856_v28, 0.0  ;;  %v860_v33 = vpop.f32.mrb[11].mxu1 }
 0x264   :  { %v863_v34 = vmax.f32 %v858_v30, 0.0 }
 0x265   :  { %v864_v36 = vpack.c.bf16 %v862_v32, %v862_v32 }
 0x266   :  { %v865_v35 = vpack.c.bf16 %v863_v34, %v863_v34 }
 0x268   :  { %1102 = vmatprep.mubr.bf16.mxu0 %v865_v35 }
 0x269   :  { %1103 = vmatmul.mubr.bf16.vlgmr.msra.gmra.mrb[8].mxu0 %v864_v36 }
 0x33c   :  { %v1104_v45 = vpop.f32.mrb[8].mxu0 }
 0x33d   :  { %v1105_v46 = vadd.f32 %v1104_v45, %v903_v42  ;;  %v1106_v47 = vpop.f32.mrb[9].mxu0 }
 0x33e   :  { %v1107_v48 = vadd.f32 %v1106_v47, %v907_v44  ;;  %v1108_v49 = vpop.f32.mrb[10].mxu0 }
 0x33f   :  { %v1111_v50 = vmax.f32 %v1105_v46, 0.0  ;;  %v1109_v51 = vpop.f32.mrb[11].mxu0 }
 0x340   :  { %v1112_v52 = vmax.f32 %v1107_v48, 0.0 }
 0x341   :  { %v1113_v55 = vpack.c.bf16 %v1111_v50, %v1111_v50 }
 0x342   :  { %v1114_v53 = vpack.c.bf16 %v1112_v52, %v1112_v52 }
 0x344   :  { %1282 = vmatprep.mubr.bf16.mxu1 %v1114_v53 }
 0x345   :  { %1283 = vmatmul.mubr.bf16.vlgmr.msra.gmra.mrb[12].mxu1 %v1113_v55 }
 0x346   :  { %1674 = vmatpush3.bf16.msra.mxu1 %v1851_v54  ;;  %1689 = vmatprep.mubr.msk.bf16.mxu1 %vm2038_vm0, %v2037_v43 }
 0x347   :  { %1675 = vmatprep.subr.bf16.mxu1 %v2037_v43 }
 0x34a   :  { %1676 = vmatpush3.bf16.msra.mxu1 %v1852_v56 }
 0x34b   :  { %1677 = vmatprep.subr.bf16.mxu1 %v2037_v43 }
 0x34e   :  { %1678 = vmatpush3.bf16.msra.mxu1 %v1853_v57 }
 0x34f   :  { %1679 = vmatprep.subr.bf16.mxu1 %v2037_v43 }
 0x352   :  { %1680 = vmatpush3.bf16.msra.mxu1 %v1854_v58 }
 0x353   :  { %1681 = vmatprep.subr.bf16.mxu1 %v2037_v43 }
 0x356   :  { %1682 = vmatpush3.bf16.msra.mxu1 %v1855_v59 }
 0x357   :  { %1683 = vmatprep.subr.bf16.mxu1 %v2037_v43 }
 0x35a   :  { %1684 = vmatpush3.bf16.msra.mxu1 %v1856_v60 }
 0x35b   :  { %1685 = vmatprep.subr.bf16.mxu1 %v2037_v43 }
 0x35e   :  { %1686 = vmatpush3.bf16.msra.mxu1 %v1857_v61 }
 0x35f   :  { %1687 = vmatprep.subr.bf16.mxu1 %v2037_v43  ;;  %v1559_v43 = vld [vmem:[%s2240_s10] ss:$0 sm:$0xff]  ;;  %s1995_s10 = scalar_lea.vmem %s1425_s21, 128 }
 0x360   :  { %p1996_p6 = scmp.ne.s32.totalorder %s1425_s21, %s1995_s10  ;;  %p2001_p8 = scmp.lt.s32.totalorder %s1995_s10, %s1995_s10 }
 0x362   :  { %1688 = vmatpush3.bf16.msra.mxu1 %v1858_v62  ;;  %p2002_p9 = por %p2001_p8, %p2000_p7 }
 0x364   :  { %p2003_p10 = pnand %p2002_p9, %p1996_p6 }
 0x418   :  { %v1652_v63 = vpop.f32.mrb[12].mxu1 }
 0x419   :  { %v1653_v1 = vpop.f32.mrb[13].mxu1 }
 0x41a   :  { %v1654_v2 = vadd.f32 %v1653_v1, %v1652_v63  ;;  %v1655_v3 = vpop.f32.mrb[14].mxu1 }
 0x41b   :  { %v1656_v4 = vpop.f32.mrb[15].mxu1 }
 0x41c   :  { %v1285_v5 = vadd.f32 %v1654_v2, %v1542_v0 }
 0x41e   :  { %v1290_v6 = vmax.f32 %v1285_v5, 0.0 }
 0x420   :  { %v1291_v7 = vpack.c.bf16 %v1290_v6, %v1290_v6 }
 0x422   :  { %1690 = vmatmul.mubr.bf16.vlgmr.msra.gmra.mrb[16].mxu1 %v1291_v7 }
 0x4f5   :  { %v1397_v9 = vpop.f32.mrb[16].mxu1 }
 0x4f6   :  { %v1398_v10 = vadd.f32 %v1559_v43, %v1397_v9  ;;  %v1691_v11 = vpop.f32.mrb[17].mxu1 }
 0x4f7   :  { %v1400_v12 = vpop.f32.mrb[18].mxu1 }
 0x4f8   :  { %v1692_v13 = vpop.f32.mrb[19].mxu1  ;;  %v1406_v14 = vsel %vm1405_vm2, %v1398_v10, -1e+30 }
 0x4f9   :  { %1407 = vmax.xlane.f32.xlu0 %v1406_v14 }
 0x586   :  { %v1408_v15 = vpop.xlane.xlu0 %1407 }
 0x587   :  { %v1409_v16 = vsub.f32 %v1406_v14, %v1408_v15 }
 0x589   :  { %v1410_v17 = vmul.f32 1.442695, %v1409_v16 }
 0x58b   :  { %1859 = vpow2.f32 %v1410_v17 }
 0x595   :  { %v1860_v18 = vpop.eup %1859 }
 0x596   :  { %1412 = vadd.xlane.f32.xlu0 %v1860_v18 }
 0x623   :  { %v1413_v19 = vpop.xlane.xlu0 %1412 }
 0x624   :  { %1861 = vlog2.f32 %v1413_v19 }
 0x62e   :  { %v1862_v20 = vpop.eup %1861 }
 0x62f   :  { %v1415_v21 = vmul.f32 0.6931472, %v1862_v20 }
 0x631   :  { %v1416_v22 = vsub.f32 %v1409_v16, %v1415_v21 }
 0x633   :  { %1417 = vst [vmem:[#allocation13] sm:$0xff] %v1416_v22 }
 0x634   :  { %2006 = shalt.err (!%p2003_p10)
}
 0x635   :  { %s2007_s26 = scalar_lea.hbm %s2241_s11, 128 }
 0x636   :  { %p2008_p11 = scmp.ne.s32.totalorder %s2241_s11, %s2007_s26  ;;  %p2011_p12 = scmp.lt.u32.totalorder %s2007_s26, %s2241_s11 }
 0x638   :  { %p2013_p13 = pnand %p2011_p12, %p2008_p11 }
 0x63a   :  { %2016 = shalt.err (!%p2013_p13)
}
 0x63b   :  { %1427 = dma.vmem_to_hbm [thread:$0]  %s1425_s21, 128, %s2241_s11, [#allocation4]  }
 0x63c   :  { %2025 = dma.done.wait [#allocation4], 128  }
 0x63d   :  { %2026 = vsyncadd [#allocation4], 4294967168 }
 0x63e   :  { %1431 = vsyncpa [#allocation3], 1 }
 0x63f   :  { %1432 = vsyncpa [#allocation6], 1 }
 0x640   :  { %1433 = vsyncpa [#allocation9], 1 }
 0x641   :  { %1434 = vsyncpa [#allocation12], 1 }
 0x642   :  { %1435 = vsyncpa [#allocation4], 1 }

</bundles_post_ra>
